<compile_context>
chip_gen: v6e
topology: v6e:2x2x1
jax: 0.10.0
libtpu: 0.0.40
codegen_flags: <defaults>
</compile_context>

<pallas_src>
import jax
import jax.numpy as jnp
from jax.experimental import pallas as pl
from jax.experimental.pallas import tpu as pltpu


def _gain_kernel(gain_lin_ref, x_ref, o_ref):
    # gain_lin_ref : (B,) f32 in SMEM (scalar-prefetched) -- per-example linear gain
    # x_ref / o_ref: (1, r_tile, C) VMEM tiles
    b = pl.program_id(0)
    g = gain_lin_ref[b]  # f32 scalar read from SMEM, broadcast on the VPU
    o_ref[...] = (x_ref[...].astype(jnp.float32) * g).astype(o_ref.dtype)


def _default_block_bytes() -> int:
    # v7x (~3.2 TB/s HBM) needs bigger per-step bytes to stay DMA-bound; its
    # default scoped VMEM is 32 MiB so 4 x 4 MiB double-buffered tiles fit.
    # v5e/v6e: 2 MiB tiles already sit at ~85% of the HBM roofline and
    # 4 x 2 MiB fits the tightest (v5e, 16 MiB) default scoped-VMEM budget.
    try:
        kind = jax.devices()[0].device_kind.lower()
    except Exception:
        kind = ""
    if "v7" in kind or "7x" in kind:
        return 4 * 1024 * 1024
    return 2 * 1024 * 1024


def _pick_lane_width(t: int):
    """Return (lane_width C, padded length T_pad) with C | T_pad and C % 128 == 0."""
    for c in (1024, 512, 256, 128):
        if t % c == 0:
            return c, t
    t_pad = ((t + 127) // 128) * 128
    for c in (1024, 512, 256, 128):
        if t_pad % c == 0:
            return c, t_pad
    return 128, t_pad  # unreachable (t_pad is a multiple of 128)


def gain_pallas(audio: jnp.ndarray, gain_db: jnp.ndarray, *, block_bytes: int | None = None):
    """Apply per-example gain (in dB) to `audio` of shape (B, T)."""
    B, T = audio.shape
    dtype = audio.dtype
    itemsize = jnp.dtype(dtype).itemsize
    if block_bytes is None:
        block_bytes = _default_block_bytes()

    # dB -> linear gain factor.  B scalar exps; hoisted out of the kernel so the
    # in-kernel work is a single scalar-broadcast multiply.
    gain_lin = jnp.power(10.0, gain_db.astype(jnp.float32) / 20.0).reshape(B)

    # Sublane-dense 3-D view: (B, T) -> (B, R, C).  Free (no-copy) reshape when
    # T % 128 == 0; otherwise pad only up to the next multiple of 128.
    C, t_pad = _pick_lane_width(T)
    audio_p = audio if t_pad == T else jnp.pad(audio, ((0, 0), (0, t_pad - T)))
    R = t_pad // C
    audio_3d = audio_p.reshape(B, R, C)

    # Row-tile sized from the VMEM budget: a multiple of 8 (sublanes) or the
    # full R extent.  Partial last row-tiles are allowed (Pallas masks the
    # out-of-bounds writeback; OOB reads are don't-care for this multiply).
    budget_rows = max(8, (block_bytes // (C * itemsize)) // 8 * 8)
    if R <= budget_rows:
        r_tile, n_r = R, 1
    else:
        r_tile, n_r = budget_rows, pl.cdiv(R, budget_rows)

    out_3d = pl.pallas_call(
        _gain_kernel,
        out_shape=jax.ShapeDtypeStruct((B, R, C), dtype),
        grid_spec=pltpu.PrefetchScalarGridSpec(
            num_scalar_prefetch=1,            # gain_lin -> SMEM
            grid=(B, n_r),
            in_specs=[
                pl.BlockSpec((1, r_tile, C), lambda b, r, gain: (b, r, 0)),
            ],
            out_specs=pl.BlockSpec((1, r_tile, C), lambda b, r, gain: (b, r, 0)),
        ),
        compiler_params=pltpu.CompilerParams(
            dimension_semantics=("parallel", "parallel"),
        ),
    )(gain_lin, audio_3d)

    out = out_3d.reshape(B, t_pad)
    if t_pad != T:
        out = out[:, :T]
    return out


def gain_reference(audio: jnp.ndarray, gain_db: jnp.ndarray) -> jnp.ndarray:
    # Pure-JAX reference mirroring the PyTorch forward:
    # unsqueeze -> per-example gain multiply -> squeeze.
    expanded = audio[:, None, :].astype(jnp.float32)                       # (B, 1, T)
    factor = jnp.power(10.0, gain_db.astype(jnp.float32) / 20.0)[:, None, None]
    return (expanded * factor)[:, 0, :].astype(audio.dtype)                # (B, T)


if __name__ == "__main__":
    key = jax.random.PRNGKey(0)
    k1, k2, k3, kg = jax.random.split(key, 4)

    # torch_audiomentations.Gain defaults: min_gain_in_db=-18.0, max_gain_in_db=6.0, p=1.0.
    # TODO(synk): the random gain sampling itself lives here (host-side), matching
    # torch_audiomentations' per-example Uniform draw rather than being done in-kernel.
    min_db, max_db = -18.0, 6.0

    # Case 1: T a multiple of 1024 -> no padding, fully contiguous blocks.
    B, T = 2, 6144
    audio = jax.random.normal(k1, (B, T), dtype=jnp.float32)
    gain_db = jax.random.uniform(kg, (B,), minval=min_db, maxval=max_db, dtype=jnp.float32)
    out = jax.block_until_ready(gain_pallas(audio, gain_db))
    ref = gain_reference(audio, gain_db)
    assert out.shape == audio.shape and out.dtype == audio.dtype
    assert jnp.allclose(out, ref, rtol=1e-5, atol=1e-6)

    # Case 2: ragged T (not a multiple of 128) -> exercises pad-to-128 fallback.
    T2 = 3000
    audio2 = jax.random.normal(k2, (B, T2), dtype=jnp.float32)
    out2 = jax.block_until_ready(gain_pallas(audio2, gain_db))
    ref2 = gain_reference(audio2, gain_db)
    assert out2.shape == audio2.shape and out2.dtype == audio2.dtype
    assert jnp.allclose(out2, ref2, rtol=1e-5, atol=1e-6)

    # Case 3: T multiple of 128 only, forced tiny block -> multi-tile row grid with a
    # partial last block (verifies non-divisible-grid write masking on TPU).
    B3, T3 = 3, 2944  # 2944 = 23 * 128
    audio3 = jax.random.normal(k3, (B3, T3), dtype=jnp.float32)
    gain_db3 = jax.random.uniform(kg, (B3,), minval=min_db, maxval=max_db, dtype=jnp.float32)
    out3 = jax.block_until_ready(gain_pallas(audio3, gain_db3, block_bytes=8 * 128 * 4))
    ref3 = gain_reference(audio3, gain_db3)
    assert out3.shape == audio3.shape and out3.dtype == audio3.dtype
    assert jnp.allclose(out3, ref3, rtol=1e-5, atol=1e-6)

    print("KERNEL_OK")
</pallas_src>

<mosaic_0001>
module attributes {stable_mosaic.version = 11 : i64} {
  func.func @_gain_kernel(%arg0: i32, %arg1: i32, %arg2: memref<2xf32, #tpu.memory_space<smem>>, %arg3: memref<1x6x1024xf32, #tpu.memory_space<vmem>>, %arg4: memref<1x6x1024xf32, #tpu.memory_space<vmem>>) attributes {dimension_semantics = [#tpu.dimension_semantics<parallel>, #tpu.dimension_semantics<parallel>], iteration_bounds = array<i64: 2, 1>, scalar_prefetch = 1 : i64, scratch_operands = 0 : i64, tpu.core_type = #tpu.core_type<tc>, window_params = [{transform_indices = @transform_0, window_bounds = array<i64: 1, 6, 1024>}, {transform_indices = @transform_1, window_bounds = array<i64: 1, 6, 1024>}]} {
    %0 = arith.index_cast %arg0 : i32 to index
    %1 = memref.load %arg2[%0] : memref<2xf32, #tpu.memory_space<smem>>
    %c0 = arith.constant 0 : index
    %c0_0 = arith.constant 0 : index
    %c0_1 = arith.constant 0 : index
    %2 = vector.load %arg3[%c0, %c0_0, %c0_1] : memref<1x6x1024xf32, #tpu.memory_space<vmem>>, vector<1x6x1024xf32>
    %3 = vector.broadcast %1 : f32 to vector<1x6x1024xf32>
    %4 = arith.mulf %2, %3 : vector<1x6x1024xf32>
    %c0_2 = arith.constant 0 : index
    %c0_3 = arith.constant 0 : index
    %c0_4 = arith.constant 0 : index
    %5 = vector.load %arg4[%c0_2, %c0_3, %c0_4] : memref<1x6x1024xf32, #tpu.memory_space<vmem>>, vector<1x6x1024xf32>
    tpu.vector_store %arg4[%c0_2, %c0_3, %c0_4], %4 {strides = array<i32>} : memref<1x6x1024xf32, #tpu.memory_space<vmem>>, vector<1x6x1024xf32>,
    return
  }
  func.func @transform_0(%arg0: i32, %arg1: i32, %arg2: memref<2xf32, #tpu.memory_space<smem>>) -> (i32, i32, i32) {
    %c0_i32 = arith.constant 0 : i32
    %c0_i32_0 = arith.constant 0 : i32
    return %arg0, %arg1, %c0_i32 : i32, i32, i32
  }
  func.func @transform_1(%arg0: i32, %arg1: i32, %arg2: memref<2xf32, #tpu.memory_space<smem>>) -> (i32, i32, i32) {
    %c0_i32 = arith.constant 0 : i32
    %c0_i32_0 = arith.constant 0 : i32
    return %arg0, %arg1, %c0_i32 : i32, i32, i32
  }
}

</mosaic_0001>

<bundles_post_ra>
// kernel: tpu_custom_call.1
= control target key start
LH: loop header
LB: loop body
LE: loop exit
PB: predicated region body
PF: predicated region fallthrough
CT: control target
= control target key end

     0   :  { %s406_s0 = inlined_call_operand.vmem [shape: f32[2], index: 0, kind: input, shape index: {}]   ;;  %s407_s1 = inlined_call_operand.vmem [shape: f32[2,6,1024], index: 1, kind: input, shape index: {}]   ;;  %s408_s2 = inlined_call_operand.vmem [shape: f32[2,6,1024], index: 2, kind: output, shape index: {}]  }
   0x1   :  { %s7_s11 = sshll.u32 %s406_s0, 4  ;;  %s8_s11 = int_to_ptr.vmem [resolvable:$true] %s7_s11 }
   0x2   :  { %s316_s12 = scalar_lea.vmem %s8_s11, 16  ;;  %p321_p1 = scmp.lt.s32.totalorder %s8_s11, %s8_s11 }
   0x3   :  { %p317_p0 = scmp.ne.s32.totalorder %s8_s11, %s316_s12  ;;  %p322_p2 = scmp.lt.s32.totalorder %s316_s12, %s316_s12 }
   0x5   :  { %p323_p3 = por %p322_p2, %p321_p1 }
   0x7   :  { %p324_p4 = pnand %p323_p3, %p317_p0 }
   0x9   :  { %327 = shalt.err (!%p324_p4)  }
   0xa   :  { %s354_s13 = smov [#allocation3]  }
   0xb   :  { %10 = dma.vmem_to_smem %s8_s11, 16, %s354_s13, [#allocation2] }
   0xc   :  { %340 = dma.done.wait [#allocation2], 16 }
   0xd   :  { %341 = vsyncadd [#allocation2], 4294967280 }
   0xe   :  { %12 = sfence }
   0xf   :  { %s373_s14 = smov 0   ;;  %s375_s15 = smov 0  }
  0x10   :  { %s377_s16 = smov 0  }
  0x11 LB: > { %s30_s0 = sadd.s32 1, %s348_s15  ;;  %p282_p5 = scmp.ge.s32.totalorder %s352_s16, 1  ;;  %s352_s16 = sphi %s377_s16, %s18_s16   ;;  %s348_s15 = sphi %s375_s15, %s410_s15   ;;  %s344_s14 = sphi %s373_s14, %s409_s14  }
  0x12   : > { %p32_p6 = scmp.ge.s32.totalorder %s30_s0, 2  ;;  %p114_p7 = scmp.lt.s32.totalorder %s352_s16, 3 }
  0x14   : > { %s412_s0 = smov (%p32_p6, %s30_s0), 0  ;;  %p115_p8 = pnand %p282_p5, %p114_p7 }
  0x15   : > { %p142_p9 = scmp.lt.s32.totalorder (!%p115_p8), %s344_s14, 1  ;;  %s160_s17 = sld [smem:[#allocation3 + %s344_s14]] (!%p115_p8) }
  0x16   : > { %118 = sbr.rel (%p115_p8) target bundleno = 37 (0x25), region = 24 }
  0x1b   : > { %s414_s14 = smov (!%p142_p9, %s344_s14), 1  ;;  %v169_v1 = vstv %s160_s17 }
  0x1c   : > { %s289_s18 = sshll.u32 %s414_s14, 6 }
  0x1d   : > { %s150_s21 = scalar_lea.vmem %s407_s1, %s289_s18  ;;  %s159_s24 = scalar_lea.vmem %s408_s2, %s289_s18 }
  0x1e   : > { %v161_v0 = vld [vmem:[%s150_s21] sm:$0x3f]  ;;  %v162_v2 = vld [vmem:[%s150_s21 + $0x8] sm:$0x3f]  ;;  %v163_v3 = vld [vmem:[%s150_s21 + $0x10] sm:$0x3f] }
  0x1f   : > { %v170_v4 = vmul.f32 %v169_v1, %v161_v0  ;;  %v171_v5 = vmul.f32 %v169_v1, %v162_v2  ;;  %v172_v6 = vmul.f32 %v169_v1, %v163_v3  ;;  %v164_v7 = vld [vmem:[%s150_s21 + $0x18] sm:$0x3f]  ;;  %v165_v8 = vld [vmem:[%s150_s21 + $0x20] sm:$0x3f]  ;;  %v166_v9 = vld [vmem:[%s150_s21 + $0x28] sm:$0x3f] }
  0x20   : > { %v173_v10 = vmul.f32 %v169_v1, %v164_v7  ;;  %v174_v11 = vmul.f32 %v169_v1, %v165_v8  ;;  %v175_v12 = vmul.f32 %v169_v1, %v166_v9  ;;  %v167_v13 = vld [vmem:[%s150_s21 + $0x30] sm:$0x3f]  ;;  %v168_v14 = vld [vmem:[%s150_s21 + $0x38] sm:$0x3f] }
  0x21   : > { %178 = vst [vmem:[%s159_s24] sm:$0x3f] %v170_v4  ;;  %179 = vst [vmem:[%s159_s24 + $0x8] sm:$0x3f] %v171_v5  ;;  %v176_v15 = vmul.f32 %v169_v1, %v167_v13  ;;  %v177_v16 = vmul.f32 %v169_v1, %v168_v14 }
  0x22   : > { %180 = vst [vmem:[%s159_s24 + $0x10] sm:$0x3f] %v172_v6  ;;  %181 = vst [vmem:[%s159_s24 + $0x18] sm:$0x3f] %v173_v10 }
  0x23   : > { %182 = vst [vmem:[%s159_s24 + $0x20] sm:$0x3f] %v174_v11  ;;  %183 = vst [vmem:[%s159_s24 + $0x28] sm:$0x3f] %v175_v12 }
  0x24   : > { %184 = vst [vmem:[%s159_s24 + $0x30] sm:$0x3f] %v176_v15  ;;  %185 = vst [vmem:[%s159_s24 + $0x38] sm:$0x3f] %v177_v16 }
  0x25 PF: > { %s18_s16 = sadd.s32 1, %s352_s16   ;;  %s409_s14 = smov %s348_s15 }
  0x26   : > { %p15_p10 = scmp.ge.s32.totalorder %s18_s16, 4   ;;  %s410_s15 = smov %s412_s0 }
  0x28   :  { %17 = sbr.rel (!%p15_p10) target bundleno = 17 (0x11), region = 54 }

</bundles_post_ra>
